<compile_context>
chip_gen: v5e
topology: v5e:2x2
jax: 0.10.0
libtpu: 0.0.40
codegen_flags: <defaults>
</compile_context>

<pallas_src>
import functools

import jax
import jax.numpy as jnp
from jax.experimental import pallas as pl
from jax.experimental.pallas import tpu as pltpu


def _round_up(x, m):
    return (x + m - 1) // m * m


def _pick_tile_n(n_rows, n_classes, itemsize):
    """Rows per grid step: as large as possible while the double-buffered input
    tiles plus the in-kernel f32 working copy stay well under the smallest
    scoped-VMEM default across generations (v5e: 16 MiB, v7x: 32 MiB)."""
    budget = 6 * 1024 * 1024                       # bytes for preds tiles
    per_row = n_classes * (2 * max(int(itemsize), 1) + 4)  # 2 pipeline bufs + f32 copy
    t = budget // per_row
    t = max(8, min(512, (int(t) // 8) * 8))
    return min(t, _round_up(n_rows, 8))


def _lsce_kernel(preds_ref, tgt_ref, part_ref, *, n_batch, tile_n):
    i = pl.program_id(0)

    x = preds_ref[...].astype(jnp.float32)        # (TILE_N, C)
    tgt = tgt_ref[...]                            # (TILE_N, 1) int32
    c = x.shape[-1]

    # Stable logsumexp pieces; no full log-softmax materialization.
    m = jnp.max(x, axis=-1, keepdims=True)                            # (TILE_N, 1)
    lse = jnp.log(jnp.sum(jnp.exp(x - m), axis=-1, keepdims=True))    # (TILE_N, 1)
    z = m + lse                                                       # log sum exp(x)

    # Smoothing term per row: -sum_c logp = C*z - sum_c x
    row_sum_x = jnp.sum(x, axis=-1, keepdims=True)                    # (TILE_N, 1)
    smooth = jnp.float32(c) * z - row_sum_x                           # (TILE_N, 1)

    # NLL per row: z - x[target], gathered with a one-hot lane mask.
    col = jax.lax.broadcasted_iota(jnp.int32, x.shape, 1)             # (TILE_N, C)
    x_t = jnp.sum(jnp.where(col == tgt, x, 0.0), axis=-1, keepdims=True)
    nll = z - x_t                                                     # (TILE_N, 1)

    # Mask rows beyond the true batch size (zero-padded on the host).
    rows = i * tile_n + jax.lax.broadcasted_iota(jnp.int32, (tile_n, 1), 0)
    valid = (rows < n_batch).astype(jnp.float32)
    smooth_sum = jnp.sum(smooth * valid)
    nll_sum = jnp.sum(nll * valid)

    # Per-tile partials: [0,0]=smoothing sum, [0,1]=nll sum, rest zeros.
    sub = jax.lax.broadcasted_iota(jnp.int32, (1, 8, 128), 1)
    lane = jax.lax.broadcasted_iota(jnp.int32, (1, 8, 128), 2)
    part_ref[...] = jnp.where(
        (sub == 0) & (lane == 0), smooth_sum,
        jnp.where((sub == 0) & (lane == 1), nll_sum, 0.0))


def label_smoothed_cross_entropy(preds, target, epsilon=0.1, reduction="mean"):
    """Matches LabelSmoothedCrossEntropy.forward for reduction in {'mean','sum'}."""
    n_batch, n_classes = preds.shape
    tile_n = _pick_tile_n(n_batch, n_classes, jnp.dtype(preds.dtype).itemsize)
    n_pad = _round_up(n_batch, tile_n)
    num_tiles = n_pad // tile_n

    target2d = target.reshape(n_batch, 1).astype(jnp.int32)
    if n_pad != n_batch:
        preds = jnp.pad(preds, ((0, n_pad - n_batch), (0, 0)))
        target2d = jnp.pad(target2d, ((0, n_pad - n_batch), (0, 0)))

    kernel = functools.partial(_lsce_kernel, n_batch=n_batch, tile_n=tile_n)

    cost = pl.CostEstimate(
        flops=5 * n_pad * n_classes,
        transcendentals=n_pad * n_classes,
        bytes_accessed=(n_pad * n_classes * jnp.dtype(preds.dtype).itemsize
                        + n_pad * 4 + num_tiles * 8 * 128 * 4),
    )

    partials = pl.pallas_call(
        kernel,
        out_shape=jax.ShapeDtypeStruct((num_tiles, 8, 128), jnp.float32),
        grid_spec=pltpu.PrefetchScalarGridSpec(
            num_scalar_prefetch=0,
            grid=(num_tiles,),
            in_specs=[
                pl.BlockSpec((tile_n, n_classes), lambda i: (i, 0)),
                pl.BlockSpec((tile_n, 1), lambda i: (i, 0)),
            ],
            out_specs=pl.BlockSpec((1, 8, 128), lambda i: (i, 0, 0)),
        ),
        compiler_params=pltpu.CompilerParams(
            dimension_semantics=("parallel",),
        ),
        cost_estimate=cost,
    )(preds, target2d)

    reduced = jnp.sum(partials, axis=0)      # (8, 128)
    sum_smooth = reduced[0, 0]
    sum_nll = reduced[0, 1]

    if reduction == "mean":
        loss = sum_smooth / n_batch
        nll = sum_nll / n_batch
    elif reduction == "sum":
        loss = sum_smooth
        nll = sum_nll
    else:
        raise NotImplementedError("only 'mean' and 'sum' reductions supported")

    return epsilon * (loss / n_classes) + (1.0 - epsilon) * nll


def _reference(preds, target, epsilon=0.1, reduction="mean"):
    logp = jax.nn.log_softmax(preds.astype(jnp.float32), axis=-1)
    loss = -jnp.sum(logp, axis=-1)
    nll = -jnp.take_along_axis(logp, target[:, None], axis=-1)[:, 0]
    if reduction == "mean":
        loss, nll = loss.mean(), nll.mean()
    else:
        loss, nll = loss.sum(), nll.sum()
    n = preds.shape[-1]
    return epsilon * (loss / n) + (1.0 - epsilon) * nll


if __name__ == "__main__":
    key = jax.random.PRNGKey(0)

    # Case 1: tile-aligned batch, small class count (full-extent last dim).
    k1, k2, k3, k4 = jax.random.split(key, 4)
    N1, C1 = 8, 32
    preds1 = jax.random.normal(k1, (N1, C1), dtype=jnp.float32)
    target1 = jax.random.randint(k2, (N1,), 0, C1, dtype=jnp.int32)
    out1 = jax.block_until_ready(
        label_smoothed_cross_entropy(preds1, target1, epsilon=0.1, reduction="mean"))
    ref1 = _reference(preds1, target1, epsilon=0.1, reduction="mean")
    assert jnp.allclose(out1, ref1, rtol=1e-4, atol=1e-4), (out1, ref1)

    # Case 2: batch not a multiple of the tile (exercises row masking), 'sum'.
    N2, C2 = 12, 160
    preds2 = jax.random.normal(k3, (N2, C2), dtype=jnp.float32)
    target2 = jax.random.randint(k4, (N2,), 0, C2, dtype=jnp.int32)
    out2 = jax.block_until_ready(
        label_smoothed_cross_entropy(preds2, target2, epsilon=0.1, reduction="sum"))
    ref2 = _reference(preds2, target2, epsilon=0.1, reduction="sum")
    assert jnp.allclose(out2, ref2, rtol=1e-4, atol=1e-4), (out2, ref2)

    print("KERNEL_OK")
</pallas_src>

<mosaic_0001>
module attributes {stable_mosaic.version = 11 : i64} {
  func.func @_lsce_kernel(%arg0: i32, %arg1: memref<8x32xf32, #tpu.memory_space<vmem>>, %arg2: memref<8x1xi32, #tpu.memory_space<vmem>>, %arg3: memref<1x8x128xf32, #tpu.memory_space<vmem>>) attributes {dimension_semantics = [#tpu.dimension_semantics<parallel>], iteration_bounds = array<i64: 1>, scalar_prefetch = 0 : i64, scratch_operands = 0 : i64, tpu.core_type = #tpu.core_type<tc>, window_params = [{transform_indices = @transform_0, window_bounds = array<i64: 8, 32>}, {transform_indices = @transform_1, window_bounds = array<i64: 8, 1>}, {transform_indices = @transform_2, window_bounds = array<i64: 1, 8, 128>}]} {
    %c0 = arith.constant 0 : index
    %c0_0 = arith.constant 0 : index
    %0 = vector.load %arg1[%c0, %c0_0] : memref<8x32xf32, #tpu.memory_space<vmem>>, vector<8x32xf32>
    %c0_1 = arith.constant 0 : index
    %c0_2 = arith.constant 0 : index
    %1 = vector.load %arg2[%c0_1, %c0_2] : memref<8x1xi32, #tpu.memory_space<vmem>>, vector<8x1xi32>
    %cst = arith.constant dense<0xFF800000> : vector<8xf32>
    %2 = vector.multi_reduction <maximumf>, %0, %cst [1] : vector<8x32xf32> to vector<8xf32>
    %3 = vector.shape_cast %2 : vector<8xf32> to vector<8x1xf32>
    %4 = vector.broadcast %3 : vector<8x1xf32> to vector<8x32xf32>
    %5 = arith.subf %0, %4 : vector<8x32xf32>
    %6 = math.exp %5 : vector<8x32xf32>
    %cst_3 = arith.constant dense<0.000000e+00> : vector<8xf32>
    %7 = vector.multi_reduction <add>, %6, %cst_3 [1] : vector<8x32xf32> to vector<8xf32>
    %8 = vector.shape_cast %7 : vector<8xf32> to vector<8x1xf32>
    %9 = math.log %8 : vector<8x1xf32>
    %10 = arith.addf %3, %9 : vector<8x1xf32>
    %cst_4 = arith.constant dense<0.000000e+00> : vector<8xf32>
    %11 = vector.multi_reduction <add>, %0, %cst_4 [1] : vector<8x32xf32> to vector<8xf32>
    %12 = vector.shape_cast %11 : vector<8xf32> to vector<8x1xf32>
    %cst_5 = arith.constant 3.200000e+01 : f32
    %13 = vector.broadcast %cst_5 : f32 to vector<8x1xf32>
    %14 = arith.mulf %13, %10 : vector<8x1xf32>
    %15 = arith.subf %14, %12 : vector<8x1xf32>
    %16 = tpu.iota {dimensions = array<i32: 1>} : vector<8x32xi32>
    %17 = vector.broadcast %1 : vector<8x1xi32> to vector<8x32xi32>
    %18 = arith.cmpi eq, %16, %17 : vector<8x32xi32>
    %cst_6 = arith.constant 0.000000e+00 : f32
    %19 = vector.broadcast %cst_6 : f32 to vector<8x32xf32>
    %20 = arith.select %18, %0, %19 : vector<8x32xi1>, vector<8x32xf32>
    %cst_7 = arith.constant dense<0.000000e+00> : vector<8xf32>
    %21 = vector.multi_reduction <add>, %20, %cst_7 [1] : vector<8x32xf32> to vector<8xf32>
    %22 = vector.shape_cast %21 : vector<8xf32> to vector<8x1xf32>
    %23 = arith.subf %10, %22 : vector<8x1xf32>
    %c8_i32 = arith.constant 8 : i32
    %24 = arith.muli %arg0, %c8_i32 : i32
    %25 = tpu.iota {dimensions = array<i32: 0>} : vector<8x1xi32>
    %26 = vector.broadcast %24 : i32 to vector<8x1xi32>
    %27 = arith.addi %26, %25 : vector<8x1xi32>
    %c8_i32_8 = arith.constant 8 : i32
    %28 = vector.broadcast %c8_i32_8 : i32 to vector<8x1xi32>
    %29 = arith.cmpi slt, %27, %28 : vector<8x1xi32>
    %30 = arith.extui %29 : vector<8x1xi1> to vector<8x1xi32>
    %31 = arith.sitofp %30 : vector<8x1xi32> to vector<8x1xf32>
    %32 = arith.mulf %15, %31 : vector<8x1xf32>
    %33 = vector.shape_cast %32 : vector<8x1xf32> to vector<1x8x1xf32>
    %cst_9 = arith.constant dense<0.000000e+00> : vector<1xf32>
    %34 = vector.multi_reduction <add>, %33, %cst_9 [1, 2] : vector<1x8x1xf32> to vector<1xf32>
    %35 = vector.shape_cast %34 : vector<1xf32> to vector<1x1x1xf32>
    %36 = vector.extract %35[0, 0, 0] : f32 from vector<1x1x1xf32>
    %37 = arith.mulf %23, %31 : vector<8x1xf32>
    %38 = vector.shape_cast %37 : vector<8x1xf32> to vector<1x8x1xf32>
    %cst_10 = arith.constant dense<0.000000e+00> : vector<1xf32>
    %39 = vector.multi_reduction <add>, %38, %cst_10 [1, 2] : vector<1x8x1xf32> to vector<1xf32>
    %40 = vector.shape_cast %39 : vector<1xf32> to vector<1x1x1xf32>
    %41 = vector.extract %40[0, 0, 0] : f32 from vector<1x1x1xf32>
    %42 = tpu.iota {dimensions = array<i32: 1>} : vector<1x8x128xi32>
    %43 = tpu.iota {dimensions = array<i32: 2>} : vector<1x8x128xi32>
    %c0_i32 = arith.constant 0 : i32
    %44 = vector.broadcast %c0_i32 : i32 to vector<1x8x128xi32>
    %45 = arith.cmpi eq, %42, %44 : vector<1x8x128xi32>
    %c0_i32_11 = arith.constant 0 : i32
    %46 = vector.broadcast %c0_i32_11 : i32 to vector<1x8x128xi32>
    %47 = arith.cmpi eq, %43, %46 : vector<1x8x128xi32>
    %48 = arith.andi %45, %47 : vector<1x8x128xi1>
    %c0_i32_12 = arith.constant 0 : i32
    %49 = vector.broadcast %c0_i32_12 : i32 to vector<1x8x128xi32>
    %50 = arith.cmpi eq, %42, %49 : vector<1x8x128xi32>
    %c1_i32 = arith.constant 1 : i32
    %51 = vector.broadcast %c1_i32 : i32 to vector<1x8x128xi32>
    %52 = arith.cmpi eq, %43, %51 : vector<1x8x128xi32>
    %53 = arith.andi %50, %52 : vector<1x8x128xi1>
    %cst_13 = arith.constant 0.000000e+00 : f32
    %54 = vector.broadcast %41 : f32 to vector<1x8x128xf32>
    %55 = vector.broadcast %cst_13 : f32 to vector<1x8x128xf32>
    %56 = arith.select %53, %54, %55 : vector<1x8x128xi1>, vector<1x8x128xf32>
    %57 = vector.broadcast %36 : f32 to vector<1x8x128xf32>
    %58 = arith.select %48, %57, %56 : vector<1x8x128xi1>, vector<1x8x128xf32>
    %c0_14 = arith.constant 0 : index
    %c0_15 = arith.constant 0 : index
    %c0_16 = arith.constant 0 : index
    %59 = vector.load %arg3[%c0_14, %c0_15, %c0_16] : memref<1x8x128xf32, #tpu.memory_space<vmem>>, vector<1x8x128xf32>
    tpu.vector_store %arg3[%c0_14, %c0_15, %c0_16], %58 {strides = array<i32>} : memref<1x8x128xf32, #tpu.memory_space<vmem>>, vector<1x8x128xf32>,
    return
  }
  func.func @transform_0(%arg0: i32) -> (i32, i32) {
    %c0_i32 = arith.constant 0 : i32
    %c0_i32_0 = arith.constant 0 : i32
    return %arg0, %c0_i32 : i32, i32
  }
  func.func @transform_1(%arg0: i32) -> (i32, i32) {
    %c0_i32 = arith.constant 0 : i32
    %c0_i32_0 = arith.constant 0 : i32
    return %arg0, %c0_i32 : i32, i32
  }
  func.func @transform_2(%arg0: i32) -> (i32, i32, i32) {
    %c0_i32 = arith.constant 0 : i32
    %c0_i32_0 = arith.constant 0 : i32
    %c0_i32_1 = arith.constant 0 : i32
    return %arg0, %c0_i32, %c0_i32_0 : i32, i32, i32
  }
}

</mosaic_0001>

<bundles_post_ra>
// kernel: tpu_custom_call.1
= control target key start
LH: loop header
LB: loop body
LE: loop exit
PB: predicated region body
PF: predicated region fallthrough
CT: control target
= control target key end

     0   :  { %vm14_vm0 = vcmask 261120   ;;  %s167_s0 = inlined_call_operand.vmem [shape: f32[8,32], index: 0, kind: input, shape index: {}]   ;;  %s168_s1 = inlined_call_operand.vmem [shape: s32[8,1], index: 1, kind: input, shape index: {}]   ;;  %s169_s2 = inlined_call_operand.hbm [shape: f32[1,8,128], index: 2, kind: output, shape index: {}]  }
   0x1   :  { %v12_v0 = vld [vmem:[%s167_s0] sm:$0xff] }
   0x2   :  { %7 = vsyncpa [#allocation3], 0  ;;  %v15_v1 = vsel %vm14_vm0, %v12_v0, -inf  ;;  %v137_v2 = vmov 0   ;;  %v13_v3 = vld [vmem:[%s168_s1] sm:$0xff]  ;;  %v32_v9 = vlaneseq  ;;  %v27_v11 = vsel %vm14_vm0, %v12_v0, 0.0 }
   0x3   :  { %106 = vset.pattern.permute.xlu0 %v137_v2  ;;  %vm52_vm2 = vcmask 7168   ;;  %s138_s0 = smov [#allocation2]   ;;  %s91_s16 = sshll.u32 %s169_s2, 4  ;;  %s92_s16 = int_to_ptr.hbm [resolvable:$true] %s91_s16 }
   0x4   :  { %16 = vmax.xlane.f32.xlu0 %v15_v1  ;;  %v33_v10 = vand.u32 127, %v32_v9  ;;  %v45_v40 = vshrl.u32 %v32_v9, 7  ;;  %s89_s1 = sshll.u32 %s138_s0, 4  ;;  %s90_s1 = int_to_ptr.vmem [resolvable:$true] %s89_s1 }
   0x6   :  { %vm74_vm3 = vcmp.eq.s32.totalorder %v45_v40, 0  ;;  %vm77_vm4 = vcmp.eq.s32.totalorder %v33_v10, 1  ;;  %vm75_vm5 = vcmp.eq.s32.totalorder %v33_v10, 0 }
   0x7   :  { %vm78_vm6 = vmand %vm74_vm3, %vm77_vm4 }
   0x8   :  { %vm76_vm7 = vmand %vm74_vm3, %vm75_vm5 }
  0x18   :  { %35 = vperm.xlu0 %106, %v13_v3  }
  0x77   :  { %v17_v4 = vpop.xlane.xlu0 %16 }
  0x78   :  { %v18_v5 = vsub.f32 %v12_v0, %v17_v4 }
  0x7a   :  { %v19_v6 = vmul.f32 1.442695, %v18_v5 }
  0x7c   :  { %107 = vpow2.f32 %v19_v6 }
  0x82   :  { %v108_v7 = vpop.eup %107 }
  0x83   :  { %v21_v8 = vsel %vm14_vm0, %v108_v7, 0.0 }
  0x84   :  { %22 = vadd.xlane.f32.xlu1 %v21_v8 }
  0x8a   :  { %v36_v12 = vpop.permute.xlu0 %35 }
  0x8b   :  { %vm37_vm1 = vcmp.eq.s32.totalorder %v33_v10, %v36_v12 }
  0x8c   :  { %v38_v13 = vsel %vm37_vm1, %v12_v0, 0.0  ;;  %28 = vadd.xlane.f32.xlu1 %v27_v11 }
  0x8d   :  { %v39_v14 = vsel %vm14_vm0, %v38_v13, 0.0 }
  0x8e   :  { %40 = vadd.xlane.f32.xlu2 %v39_v14 }
  0xf7   :  { %v23_v15 = vpop.xlane.xlu1 %22 }
  0xf8   :  { %109 = vlog2.f32 %v23_v15 }
  0xfe   :  { %v110_v16 = vpop.eup %109 }
  0xff   :  { %v25_v17 = vmul.f32 0.6931472, %v110_v16  ;;  %v29_v20 = vpop.xlane.xlu1 %28 }
 0x101   :  { %v26_v18 = vadd.f32 %v25_v17, %v17_v4  ;;  %v41_v19 = vpop.xlane.xlu2 %40 }
 0x103   :  { %v42_v21 = vsub.f32 %v26_v18, %v41_v19  ;;  %v30_v22 = vmul.f32 32.0, %v26_v18 }
 0x105   :  { %v31_v23 = vsub.f32 %v30_v22, %v29_v20  ;;  %v64_v24 = vsel %vm52_vm2, %v42_v21, 0.0 }
 0x106   :  { %65 = vadd.xlane.f32.xlu1 %v64_v24 }
 0x107   :  { %v53_v25 = vsel %vm52_vm2, %v31_v23, 0.0 }
 0x108   :  { %54 = vadd.xlane.f32.xlu2 %v53_v25 }
 0x179   :  { %v66_v26 = vpop.xlane.xlu1 %65 }
 0x17a   :  { %v67_v27 = vrot.slane %v66_v26, 4 }
 0x17b   :  { %v55_v28 = vpop.xlane.xlu2 %54 }
 0x17c   :  { %v68_v29 = vadd.f32 %v67_v27, %v66_v26  ;;  %v56_v30 = vrot.slane %v55_v28, 4 }
 0x17e   :  { %v69_v31 = vrot.slane %v68_v29, 2  ;;  %v57_v32 = vadd.f32 %v56_v30, %v55_v28 }
 0x180   :  { %v70_v33 = vadd.f32 %v69_v31, %v68_v29  ;;  %v58_v34 = vrot.slane %v57_v32, 2 }
 0x182   :  { %v59_v35 = vadd.f32 %v58_v34, %v57_v32  ;;  %v71_v36 = vrot.slane %v70_v33, 1 }
 0x184   :  { %v60_v37 = vrot.slane %v59_v35, 1  ;;  %v72_v39 = vadd.f32 %v71_v36, %v70_v33 }
 0x186   :  { %v61_v38 = vadd.f32 %v60_v37, %v59_v35 }
 0x188   :  { %100 = vpush %v61_v38 }
 0x189   :  { %102 = vpush %v72_v39 }
 0x1b9   :  { %s101_s13 = spop %100 }
 0x1ba   :  { %v81_v41 = vstv %s101_s13  ;;  %s103_s17 = spop %102 }
 0x1bb   :  { %v79_v42 = vstv %s103_s17 }
 0x1bc   :  { %v80_v43 = vsel %vm78_vm6, %v79_v42, 0.0 }
 0x1bd   :  { %v82_v44 = vsel %vm76_vm7, %v81_v41, %v80_v43 }
 0x1be   :  { %83 = vst [vmem:[#allocation2] sm:$0xff] %v82_v44 }
 0x1bf   :  { %94 = dma.vmem_to_hbm [thread:$0]  %s90_s1, 128, %s92_s16, [#allocation3]  }
 0x1c0   :  { %135 = dma.done.wait [#allocation3], 128  }
 0x1c1   :  { %136 = vsyncadd [#allocation3], 4294967168 }
 0x1c2   :  { %99 = vsyncpa [#allocation3], 1 }

</bundles_post_ra>
